<compile_context>
chip_gen: v5e
topology: v5e:2x2
jax: 0.10.0
libtpu: 0.0.40
codegen_flags: <defaults>
</compile_context>

<pallas_src>
import functools
import math

import jax
import jax.numpy as jnp
from jax.experimental import pallas as pl
from jax.experimental.pallas import tpu as pltpu


def _tmax_savg_fc_kernel(x_ref, w_ref, b_ref, o_ref, *, num_segments, inv_hw):
    # x_ref: (tn, T, C, HW) input slab for this N-tile
    # w_ref: (C, Kpad)      fc weight (transposed, zero-padded on K)
    # b_ref: (1, Kpad)      fc bias   (zero-padded on K)
    # o_ref: (1, tn, Kpad)  output block
    #
    # 1) temporal max over the T segments (exact in the input dtype, so no f32
    #    upcast of the bulk data is needed).
    m = x_ref[:, 0]
    for t in range(1, num_segments):
        m = jnp.maximum(m, x_ref[:, t])                       # (tn, C, HW)

    # 2) Dropout is identity at inference.
    # TODO(synk): training-mode dropout (mask + 1/(1-p) via pltpu.prng_*) not implemented.

    # 3) AdaptiveAvgPool2d(1): mean over HW, accumulated in f32.
    pooled = jnp.sum(m.astype(jnp.float32), axis=-1) * inv_hw  # (tn, C)

    # 4) fc. After pooling the contraction is only over C, so this matmul is
    #    negligible next to the HBM read of the input: keep exact f32 when the
    #    weights are f32, native bf16 MXU otherwise.
    w = w_ref[...]
    if w.dtype == jnp.float32:
        out = jnp.dot(pooled, w, preferred_element_type=jnp.float32,
                      precision=jax.lax.Precision.HIGHEST)
    else:
        out = jnp.dot(pooled.astype(w.dtype), w,
                      preferred_element_type=jnp.float32)
    o_ref[0] = (out + b_ref[...].astype(jnp.float32)).astype(o_ref.dtype)


def tmax_drop_savg_cls(input_tensor, fc_weight, fc_bias, *,
                       num_segments, num_features):
    """input_tensor: (nt, chw); fc_weight: (K, C) (nn.Linear layout); fc_bias: (K,)."""
    nt, chw = input_tensor.shape
    c = num_features
    assert chw % c == 0
    hw = chw // c
    h = math.isqrt(hw)
    assert h * h == hw, "chw must equal num_features * h * h"
    assert nt % num_segments == 0
    n = nt // num_segments
    t_seg = num_segments
    k = fc_weight.shape[0]
    k_pad = int(pl.cdiv(k, 128) * 128)

    # Free, contiguous reinterpretation of the flat layout -- no transpose,
    # no extra HBM pass (rows of an N-tile are already contiguous).
    x = input_tensor.reshape(n, t_seg, c, hw)

    # Compact weight/bias: the avg-pool is done in-kernel, so NO jnp.repeat
    # expansion of the weight by HW.
    w = jnp.pad(fc_weight.T, ((0, 0), (0, k_pad - k)))          # (C, Kpad)
    b = jnp.pad(fc_bias, (0, k_pad - k)).reshape(1, k_pad)      # (1, Kpad)

    out_dtype = jnp.result_type(input_tensor.dtype, fc_weight.dtype)

    # ---- generation-aware VMEM budget (128 MiB v5e/v6e, 64 MiB per-TC v7x) ----
    try:
        vmem_cap = int(pltpu.get_tpu_info().vmem_capacity_bytes)
    except Exception:  # conservative fallback
        vmem_cap = 64 * 1024 * 1024

    itemsize = jnp.dtype(input_tensor.dtype).itemsize
    w_itemsize = jnp.dtype(fc_weight.dtype).itemsize
    c_pad8 = -(-c // 8) * 8
    hw_lane = -(-hw // 128) * 128
    # VMEM bytes of one N-row of the x block (accounts for (8,128) tile padding).
    row_bytes = t_seg * c_pad8 * hw_lane * itemsize
    # Grid-invariant operands (weight + bias), double-buffered by the pipeline.
    fixed_bytes = 2 * (c_pad8 * k_pad * w_itemsize + 8 * k_pad * w_itemsize)

    # ---- N tile size: largest divisor of n that fits the budget and (when
    # possible) keeps >= 2 tiles so both v7x TensorCores get work. ----
    budget = max((vmem_cap - fixed_bytes) // 2, row_bytes)
    tn = 1
    for cand in range(1, n + 1):
        if n % cand:
            continue
        block_bytes = 2 * cand * row_bytes + 2 * max(cand, 8) * k_pad * 4
        if block_bytes > budget:
            continue
        if n // cand >= 2 or n == 1:
            tn = cand
    n_tiles = n // tn

    vmem_needed = (2 * tn * row_bytes                 # x block, double buffered
                   + fixed_bytes                      # weight + bias
                   + 2 * max(tn, 8) * k_pad * 4)      # output block
    vmem_limit = int(min(max(2 * vmem_needed + (1 << 20), 32 * 1024 * 1024),
                         vmem_cap - (4 << 20)))

    kernel = functools.partial(_tmax_savg_fc_kernel,
                               num_segments=t_seg, inv_hw=1.0 / hw)

    grid_spec = pltpu.PrefetchScalarGridSpec(
        num_scalar_prefetch=0,
        grid=(n_tiles,),
        in_specs=[
            pl.BlockSpec((tn, t_seg, c, hw), lambda i: (i, 0, 0, 0)),
            pl.BlockSpec((c, k_pad), lambda i: (0, 0)),
            pl.BlockSpec((1, k_pad), lambda i: (0, 0)),
        ],
        out_specs=pl.BlockSpec((1, tn, k_pad), lambda i: (i, 0, 0)),
    )

    out3 = pl.pallas_call(
        kernel,
        out_shape=jax.ShapeDtypeStruct((n_tiles, tn, k_pad), out_dtype),
        grid_spec=grid_spec,
        compiler_params=pltpu.CompilerParams(
            dimension_semantics=("parallel",),
            vmem_limit_bytes=vmem_limit,
        ),
    )(x, w, b)

    return out3.reshape(n, k_pad)[:, :k]


def _reference(input_tensor, fc_weight, fc_bias, *, num_segments, num_features):
    nt, chw = input_tensor.shape
    hw = chw // num_features
    h = math.isqrt(hw)
    x = input_tensor.reshape(-1, num_segments, num_features, h, h)
    x = jnp.max(x, axis=1)                            # (N, C, H, W)
    pooled = jnp.mean(x, axis=(2, 3))                 # (N, C)
    return jnp.dot(pooled, fc_weight.T,
                   precision=jax.lax.Precision.HIGHEST) + fc_bias


if __name__ == "__main__":
    # Small shapes consistent with the module.
    batch = 2
    num_segments = 8
    num_features = 32      # channels C
    h = 4                  # spatial
    num_classes = 10
    dprob = 0.5            # dropout prob; identity at inference

    nt = batch * num_segments
    chw = num_features * h * h

    key = jax.random.PRNGKey(0)
    kx, kw, kb = jax.random.split(key, 3)

    x = jax.random.normal(kx, (nt, chw), dtype=jnp.float32)
    bound = 1.0 / (num_features ** 0.5)
    fc_weight = jax.random.uniform(kw, (num_classes, num_features),
                                   minval=-bound, maxval=bound, dtype=jnp.float32)
    fc_bias = jax.random.uniform(kb, (num_classes,),
                                 minval=-bound, maxval=bound, dtype=jnp.float32)

    out = tmax_drop_savg_cls(x, fc_weight, fc_bias,
                             num_segments=num_segments, num_features=num_features)
    out = jax.block_until_ready(out)

    ref = _reference(x, fc_weight, fc_bias,
                     num_segments=num_segments, num_features=num_features)
    assert out.shape == (batch, num_classes), out.shape
    max_err = float(jnp.max(jnp.abs(out - ref)))
    assert max_err < 1e-4, f"max abs err {max_err}"

    print("KERNEL_OK")
</pallas_src>

<mosaic_0001>
module attributes {stable_mosaic.version = 11 : i64} {
  func.func @_tmax_savg_fc_kernel(%arg0: i32, %arg1: memref<1x8x32x16xf32, #tpu.memory_space<vmem>>, %arg2: memref<32x128xf32, #tpu.memory_space<vmem>>, %arg3: memref<1x128xf32, #tpu.memory_space<vmem>>, %arg4: memref<1x1x128xf32, #tpu.memory_space<vmem>>) attributes {dimension_semantics = [#tpu.dimension_semantics<parallel>], iteration_bounds = array<i64: 2>, scalar_prefetch = 0 : i64, scratch_operands = 0 : i64, tpu.core_type = #tpu.core_type<tc>, window_params = [{transform_indices = @transform_0, window_bounds = array<i64: 1, 8, 32, 16>}, {pipeline_mode = #tpu.pipeline_mode<synchronous>, transform_indices = @transform_1, window_bounds = array<i64: 32, 128>}, {pipeline_mode = #tpu.pipeline_mode<synchronous>, transform_indices = @transform_2, window_bounds = array<i64: 1, 128>}, {transform_indices = @transform_3, window_bounds = array<i64: 1, 1, 128>}]} {
    %c0 = arith.constant 0 : index
    %c0_0 = arith.constant 0 : index
    %c0_1 = arith.constant 0 : index
    %c0_2 = arith.constant 0 : index
    %0 = vector.load %arg1[%c0, %c0_0, %c0_1, %c0_2] : memref<1x8x32x16xf32, #tpu.memory_space<vmem>>, vector<1x1x32x16xf32>
    %1 = vector.shape_cast %0 : vector<1x1x32x16xf32> to vector<1x32x16xf32>
    %c0_3 = arith.constant 0 : index
    %c1 = arith.constant 1 : index
    %c0_4 = arith.constant 0 : index
    %c0_5 = arith.constant 0 : index
    %2 = vector.load %arg1[%c0_3, %c1, %c0_4, %c0_5] : memref<1x8x32x16xf32, #tpu.memory_space<vmem>>, vector<1x1x32x16xf32>
    %3 = vector.shape_cast %2 : vector<1x1x32x16xf32> to vector<1x32x16xf32>
    %4 = arith.maximumf %1, %3 : vector<1x32x16xf32>
    %c0_6 = arith.constant 0 : index
    %c2 = arith.constant 2 : index
    %c0_7 = arith.constant 0 : index
    %c0_8 = arith.constant 0 : index
    %5 = vector.load %arg1[%c0_6, %c2, %c0_7, %c0_8] : memref<1x8x32x16xf32, #tpu.memory_space<vmem>>, vector<1x1x32x16xf32>
    %6 = vector.shape_cast %5 : vector<1x1x32x16xf32> to vector<1x32x16xf32>
    %7 = arith.maximumf %4, %6 : vector<1x32x16xf32>
    %c0_9 = arith.constant 0 : index
    %c3 = arith.constant 3 : index
    %c0_10 = arith.constant 0 : index
    %c0_11 = arith.constant 0 : index
    %8 = vector.load %arg1[%c0_9, %c3, %c0_10, %c0_11] : memref<1x8x32x16xf32, #tpu.memory_space<vmem>>, vector<1x1x32x16xf32>
    %9 = vector.shape_cast %8 : vector<1x1x32x16xf32> to vector<1x32x16xf32>
    %10 = arith.maximumf %7, %9 : vector<1x32x16xf32>
    %c0_12 = arith.constant 0 : index
    %c4 = arith.constant 4 : index
    %c0_13 = arith.constant 0 : index
    %c0_14 = arith.constant 0 : index
    %11 = vector.load %arg1[%c0_12, %c4, %c0_13, %c0_14] : memref<1x8x32x16xf32, #tpu.memory_space<vmem>>, vector<1x1x32x16xf32>
    %12 = vector.shape_cast %11 : vector<1x1x32x16xf32> to vector<1x32x16xf32>
    %13 = arith.maximumf %10, %12 : vector<1x32x16xf32>
    %c0_15 = arith.constant 0 : index
    %c5 = arith.constant 5 : index
    %c0_16 = arith.constant 0 : index
    %c0_17 = arith.constant 0 : index
    %14 = vector.load %arg1[%c0_15, %c5, %c0_16, %c0_17] : memref<1x8x32x16xf32, #tpu.memory_space<vmem>>, vector<1x1x32x16xf32>
    %15 = vector.shape_cast %14 : vector<1x1x32x16xf32> to vector<1x32x16xf32>
    %16 = arith.maximumf %13, %15 : vector<1x32x16xf32>
    %c0_18 = arith.constant 0 : index
    %c6 = arith.constant 6 : index
    %c0_19 = arith.constant 0 : index
    %c0_20 = arith.constant 0 : index
    %17 = vector.load %arg1[%c0_18, %c6, %c0_19, %c0_20] : memref<1x8x32x16xf32, #tpu.memory_space<vmem>>, vector<1x1x32x16xf32>
    %18 = vector.shape_cast %17 : vector<1x1x32x16xf32> to vector<1x32x16xf32>
    %19 = arith.maximumf %16, %18 : vector<1x32x16xf32>
    %c0_21 = arith.constant 0 : index
    %c7 = arith.constant 7 : index
    %c0_22 = arith.constant 0 : index
    %c0_23 = arith.constant 0 : index
    %20 = vector.load %arg1[%c0_21, %c7, %c0_22, %c0_23] : memref<1x8x32x16xf32, #tpu.memory_space<vmem>>, vector<1x1x32x16xf32>
    %21 = vector.shape_cast %20 : vector<1x1x32x16xf32> to vector<1x32x16xf32>
    %22 = arith.maximumf %19, %21 : vector<1x32x16xf32>
    %cst = arith.constant dense<0.000000e+00> : vector<1x32xf32>
    %23 = vector.multi_reduction <add>, %22, %cst [2] : vector<1x32x16xf32> to vector<1x32xf32>
    %cst_24 = arith.constant 6.250000e-02 : f32
    %24 = vector.broadcast %cst_24 : f32 to vector<1x32xf32>
    %25 = arith.mulf %23, %24 : vector<1x32xf32>
    %c0_25 = arith.constant 0 : index
    %c0_26 = arith.constant 0 : index
    %26 = vector.load %arg2[%c0_25, %c0_26] : memref<32x128xf32, #tpu.memory_space<vmem>>, vector<32x128xf32>
    %cst_27 = arith.constant dense<0.000000e+00> : vector<1x128xf32>
    %27 = tpu.matmul %25, %26, %cst_27 {dimension_numbers = #tpu.dot_dimension_numbers<[1], [0], [0], [1], [0, 0, 1, 1], [], []>, precision = #tpu.contract_precision<fp32>} : vector<1x32xf32>, vector<32x128xf32>, vector<1x128xf32> -> vector<1x128xf32>
    %c0_28 = arith.constant 0 : index
    %c0_29 = arith.constant 0 : index
    %28 = vector.load %arg3[%c0_28, %c0_29] : memref<1x128xf32, #tpu.memory_space<vmem>>, vector<1x128xf32>
    %29 = arith.addf %27, %28 : vector<1x128xf32>
    %c0_30 = arith.constant 0 : index
    %c0_31 = arith.constant 0 : index
    %c0_32 = arith.constant 0 : index
    %30 = vector.load %arg4[%c0_30, %c0_31, %c0_32] : memref<1x1x128xf32, #tpu.memory_space<vmem>>, vector<1x1x128xf32>
    %31 = vector.shape_cast %30 : vector<1x1x128xf32> to vector<1x128xf32>
    %32 = vector.shape_cast %29 : vector<1x128xf32> to vector<1x1x128xf32>
    tpu.vector_store %arg4[%c0_30, %c0_31, %c0_32], %32 {strides = array<i32>} : memref<1x1x128xf32, #tpu.memory_space<vmem>>, vector<1x1x128xf32>,
    return
  }
  func.func @transform_0(%arg0: i32) -> (i32, i32, i32, i32) {
    %c0_i32 = arith.constant 0 : i32
    %c0_i32_0 = arith.constant 0 : i32
    %c0_i32_1 = arith.constant 0 : i32
    %c0_i32_2 = arith.constant 0 : i32
    return %arg0, %c0_i32, %c0_i32_0, %c0_i32_1 : i32, i32, i32, i32
  }
  func.func @transform_1(%arg0: i32) -> (i32, i32) {
    %c0_i32 = arith.constant 0 : i32
    %c0_i32_0 = arith.constant 0 : i32
    %c0_i32_1 = arith.constant 0 : i32
    return %c0_i32, %c0_i32_0 : i32, i32
  }
  func.func @transform_2(%arg0: i32) -> (i32, i32) {
    %c0_i32 = arith.constant 0 : i32
    %c0_i32_0 = arith.constant 0 : i32
    %c0_i32_1 = arith.constant 0 : i32
    return %c0_i32, %c0_i32_0 : i32, i32
  }
  func.func @transform_3(%arg0: i32) -> (i32, i32, i32) {
    %c0_i32 = arith.constant 0 : i32
    %c0_i32_0 = arith.constant 0 : i32
    %c0_i32_1 = arith.constant 0 : i32
    return %arg0, %c0_i32, %c0_i32_0 : i32, i32, i32
  }
}

</mosaic_0001>

<bundles_post_ra>
// kernel: tpu_custom_call.1
= control target key start
LH: loop header
LB: loop body
LE: loop exit
PB: predicated region body
PF: predicated region fallthrough
CT: control target
= control target key end

     0   :  { %8 = vsyncpa [#allocation3], 0  ;;  %s831_s0 = inlined_call_operand.vmem [shape: f32[2,8,32,16], index: 0, kind: input, shape index: {}]   ;;  %s832_s1 = inlined_call_operand.vmem [shape: f32[32,128], index: 1, kind: input, shape index: {}]   ;;  %s833_s2 = inlined_call_operand.vmem [shape: f32[1,128], index: 2, kind: input, shape index: {}]   ;;  %s834_s3 = inlined_call_operand.hbm [shape: f32[2,1,128], index: 3, kind: output, shape index: {}]  }
   0x1   :  { %10 = vsyncpa [#allocation3 + $0x1], 0  ;;  %s693_s12 = smov 0   ;;  %s695_s13 = smov 0  }
   0x2   :  { %s697_s14 = smov 0   ;;  %s699_s15 = smov 0  }
   0x3 LB: > { %s714_s16 = sadd.s32 4294967295, %s671_s15   ;;  %s533_s17 = sadd.s32 4294967294, %s671_s15   ;;  %s671_s15 = sphi %s699_s15, %s840_s15   ;;  %s667_s14 = sphi %s697_s14, %s839_s14   ;;  %s663_s13 = sphi %s695_s13, %s838_s13   ;;  %s659_s12 = sphi %s693_s12, %s837_s12  }
   0x4   : > { %s718_s18 = sadd.s32 1, %s671_s15   ;;  %s91_s19 = sadd.s32 1, %s667_s14 }
   0x5   : > { %s88_s20 = ssub.s32 %s671_s15, %s718_s18  ;;  %p101_p0 = scmp.ne.s32.totalorder %s667_s14, %s663_s13 }
   0x6   : > { %p89_p1 = scmp.eq.s32.totalorder %s88_s20, 0  ;;  %p102_p2 = scmp.eq.s32.totalorder %s714_s16, 1 }
   0x7   : > { %p107_p3 = scmp.ne.s32.totalorder %s663_s13, %s659_s12  ;;  %p108_p4 = scmp.eq.s32.totalorder %s533_s17, 1 }
   0x8   : > { %s729_s21 = scalar_select %p89_p1, %s667_s14, %s91_s19  }
   0x9   : > { %p731_p5 = por %p102_p2, %p101_p0  ;;  %p735_p6 = por %p108_p4, %p107_p3 }
   0xa   : > { %p536_p7 = scmp.ge.s32.totalorder %s671_s15, 1  ;;  %p140_p8 = scmp.lt.s32.totalorder %s671_s15, 3 }
   0xc   : > { %p141_p9 = pnand %p536_p7, %p140_p8 }
   0xd   : > { %p163_p10 = scmp.lt.s32.totalorder (!%p141_p9), %s714_s16, 1  ;;  %s161_s17 = sand.u32 (!%p141_p9), 1, %s663_s13  }
   0xe   : > { %144 = sbr.rel (%p141_p9) target bundleno = 323 (0x143), region = 32  ;;  %s629_s5 = scalar_lea.hbm (!%p141_p9), %s834_s3, 2 }
  0x13   : > { %s164_s24 = scalar_select %p163_p10, %s714_s16, 1  ;;  %vm235_vm0 = vcmask 130048   ;;  %vm266_vm1 = vcmask 130112   ;;  %vm270_vm2 = vcmask 195712   ;;  %vm274_vm3 = vcmask 261312  }
  0x14   : > { %vm276_vm4 = vcmask 261120  }
  0x15   : > { %s569_s25 = sshll.u32 %s164_s24, 8  ;;  %s474_s24 = scalar_lea.hbm %s834_s3, %s714_s16 }
  0x16   : > { %s746_s28 = scalar_lea.vmem %s831_s0, %s569_s25  ;;  %s162_s25 = scalar_lea.vmem [#allocation2], %s161_s17 }
  0x17   : > { %v168_v0 = vld [vmem:[%s746_s28] sm:$0xff]  ;;  %v170_v5 = vld [vmem:[%s746_s28 + $0x10] sm:$0xff]  ;;  %v169_v13 = vld [vmem:[%s746_s28 + $0x8] sm:$0xff]  ;;  %s476_s26 = sshll.u32 %s162_s25, 4  ;;  %s478_s27 = sshll.u32 %s474_s24, 4  ;;  %s477_s26 = int_to_ptr.vmem [resolvable:$true] %s476_s26  ;;  %s479_s27 = int_to_ptr.hbm [resolvable:$true] %s478_s27 }
  0x18   : > { %v539_v1 = vld [vmem:[%s746_s28 + $0x20] sm:$0xff]  ;;  %v541_v7 = vld [vmem:[%s746_s28 + $0x30] sm:$0xff]  ;;  %v540_v14 = vld [vmem:[%s746_s28 + $0x28] sm:$0xff]  ;;  %s623_s29 = sshra.s32 %s479_s27, 4  ;;  %s624_s29 = int_to_ptr.hbm [resolvable:$true] %s623_s29 }
  0x19   : > { %v543_v2 = vld [vmem:[%s746_s28 + $0x40] sm:$0xff]  ;;  %v177_v3 = vmax.f32 %v168_v0, %v539_v1  ;;  %v545_v8 = vld [vmem:[%s746_s28 + $0x50] sm:$0xff]  ;;  %v179_v10 = vmax.f32 %v170_v5, %v541_v7  ;;  %v178_v17 = vmax.f32 %v169_v13, %v540_v14  ;;  %v544_v18 = vld [vmem:[%s746_s28 + $0x48] sm:$0xff]  ;;  %s625_s30 = scalar_lea.hbm %s624_s29, 1  ;;  %p630_p0 = scmp.lt.s32.totalorder %s624_s29, %s834_s3 }
  0x1a   : > { %v547_v4 = vld [vmem:[%s746_s28 + $0x60] sm:$0xff]  ;;  %v549_v12 = vld [vmem:[%s746_s28 + $0x70] sm:$0xff]  ;;  %v548_v22 = vld [vmem:[%s746_s28 + $0x68] sm:$0xff]  ;;  %p626_p11 = scmp.ne.s32.totalorder %s624_s29, %s625_s30  ;;  %p631_p1 = scmp.lt.s32.totalorder %s629_s5, %s625_s30 }
  0x1b   : > { %v186_v6 = vmax.f32 %v177_v3, %v543_v2  ;;  %v551_v9 = vld [vmem:[%s746_s28 + $0x80] sm:$0xff]  ;;  %v188_v16 = vmax.f32 %v179_v10, %v545_v8  ;;  %v553_v21 = vld [vmem:[%s746_s28 + $0x90] sm:$0xff]  ;;  %v187_v24 = vmax.f32 %v178_v17, %v544_v18  ;;  %v171_v25 = vld [vmem:[%s746_s28 + $0x18] sm:$0xff] }
  0x1c   : > { %v555_v15 = vld [vmem:[%s746_s28 + $0xa0] sm:$0xff]  ;;  %v542_v26 = vld [vmem:[%s746_s28 + $0x38] sm:$0xff]  ;;  %v557_v29 = vld [vmem:[%s746_s28 + $0xb0] sm:$0xff]  ;;  %p627_p12 = pnand %p626_p11, %p731_p5  ;;  %p632_p2 = por %p631_p1, %p630_p0 }
  0x1d   : > { %v195_v11 = vmax.f32 %v186_v6, %v547_v4  ;;  %v559_v20 = vld [vmem:[%s746_s28 + $0xc0] sm:$0xff]  ;;  %v197_v23 = vmax.f32 %v188_v16, %v549_v12  ;;  %v546_v27 = vld [vmem:[%s746_s28 + $0x58] sm:$0xff]  ;;  %v552_v30 = vld [vmem:[%s746_s28 + $0x88] sm:$0xff]  ;;  %v180_v31 = vmax.f32 %v171_v25, %v542_v26  ;;  %v196_v34 = vmax.f32 %v187_v24, %v548_v22 }
  0x1e   : > { %v563_v32 = vld [vmem:[%s746_s28 + $0xe0] sm:$0xff]  ;;  %v550_v35 = vld [vmem:[%s746_s28 + $0x78] sm:$0xff]  ;;  %v561_v37 = vld [vmem:[%s746_s28 + $0xd0] sm:$0xff]  ;;  %v261_v24 = vlaneseq  ;;  %p628_p13 = pneg %p627_p12 }
  0x1f   : > { %v204_v19 = vmax.f32 %v195_v11, %v551_v9  ;;  %v206_v33 = vmax.f32 %v197_v23, %v553_v21  ;;  %v556_v38 = vld [vmem:[%s746_s28 + $0xa8] sm:$0xff]  ;;  %v189_v39 = vmax.f32 %v180_v31, %v546_v27  ;;  %v205_v41 = vmax.f32 %v196_v34, %v552_v30  ;;  %v554_v42 = vld [vmem:[%s746_s28 + $0x98] sm:$0xff]  ;;  %v565_v44 = vld [vmem:[%s746_s28 + $0xf0] sm:$0xff] }
  0x20   : > { %v560_v45 = vld [vmem:[%s746_s28 + $0xc8] sm:$0xff]  ;;  %v558_v49 = vld [vmem:[%s746_s28 + $0xb8] sm:$0xff]  ;;  %v254_v2 = vld [vmem:[%s832_s1 + $0x10] sm:$0xff]  ;;  %v262_v27 = vand.u32 127, %v261_v24  ;;  %p633_p3 = pnand %p632_p2, %p628_p13 }
  0x21   : > { %v213_v28 = vmax.f32 %v204_v19, %v555_v15  ;;  %v215_v40 = vmax.f32 %v206_v33, %v557_v29  ;;  %v198_v46 = vmax.f32 %v189_v39, %v550_v35  ;;  %v214_v48 = vmax.f32 %v205_v41, %v556_v38  ;;  %v564_v51 = vld [vmem:[%s746_s28 + $0xe8] sm:$0xff]  ;;  %v562_v55 = vld [vmem:[%s746_s28 + $0xd8] sm:$0xff]  ;;  %v252_v9 = vld [vmem:[%s832_s1] sm:$0xff] }
  0x22   : > { %v566_v59 = vld [vmem:[%s746_s28 + $0xf8] sm:$0xff]  ;;  %v293_v4 = vand.u32 4294901760, %v254_v2  ;;  %v253_v5 = vld [vmem:[%s832_s1 + $0x8] sm:$0xff]  ;;  %v297_v13 = vand.u32 4294901760, %v252_v9  ;;  %v264_v29 = vadd.s32 4294967288, %v262_v27  ;;  %v268_v30 = vadd.s32 4294967280, %v262_v27 }
  0x23   : > { %v222_v36 = vmax.f32 %v213_v28, %v559_v20  ;;  %v224_v47 = vmax.f32 %v215_v40, %v561_v37  ;;  %v207_v52 = vmax.f32 %v198_v46, %v554_v42  ;;  %v223_v54 = vmax.f32 %v214_v48, %v560_v45  ;;  %v255_v0 = vld [vmem:[%s832_s1 + $0x18] sm:$0xff]  ;;  %s466_s28 = scalar_lea.sflag [#allocation3], %s161_s17 }
  0x24   : > { %v291_v1 = vand.u32 4294901760, %v255_v0  ;;  %v327_v7 = vsub.f32 %v254_v2, %v293_v4  ;;  %v295_v8 = vand.u32 4294901760, %v253_v5  ;;  %v339_v17 = vsub.f32 %v252_v9, %v297_v13 }
  0x25   : > { %v231_v43 = vmax.f32 %v222_v36, %v563_v32  ;;  %v233_v53 = vmax.f32 %v224_v47, %v565_v44  ;;  %v216_v56 = vmax.f32 %v207_v52, %v558_v49  ;;  %v232_v58 = vmax.f32 %v223_v54, %v564_v51 }
  0x26   : > { %v321_v3 = vsub.f32 %v255_v0, %v291_v1  ;;  %392 = vmatpush.msra.mxu3 %v291_v1  ;;  %292 = vmatpush.msra.mxu0 %v291_v1  ;;  %v328_v11 = vand.u32 4294901760, %v327_v7  ;;  %v333_v12 = vsub.f32 %v253_v5, %v295_v8  ;;  %v340_v20 = vand.u32 4294901760, %v339_v17 }
  0x27   : > { %v236_v50 = vsel %vm235_vm0, %v231_v43, 0.0  ;;  %v242_v57 = vsel %vm235_vm0, %v233_v53, 0.0  ;;  %v225_v60 = vmax.f32 %v216_v56, %v562_v55  ;;  %v239_v61 = vsel %vm235_vm0, %v232_v58, 0.0 }
  0x28   : > { %237 = vadd.xlane.f32.xlu0 %v236_v50  ;;  %243 = vadd.xlane.f32.xlu1 %v242_v57  ;;  %v322_v6 = vand.u32 4294901760, %v321_v3  ;;  %v329_v15 = vsub.f32 %v327_v7, %v328_v11  ;;  %v334_v16 = vand.u32 4294901760, %v333_v12  ;;  %v341_v22 = vsub.f32 %v339_v17, %v340_v20  ;;  %v256_v50 = vld [vmem:[%s833_s2] sm:$0x1] }
  0x29   : > { %v234_v62 = vmax.f32 %v225_v60, %v566_v59  ;;  %363 = vmatpush.msra.mxu2 %v321_v3  ;;  %394 = vmatpush.msra.mxu3 %v293_v4  ;;  %v272_v34 = vadd.s32 4294967272, %v262_v27 }
  0x2a   : > { %294 = vmatpush.msra.mxu0 %v293_v4  ;;  %v323_v10 = vsub.f32 %v321_v3, %v322_v6  ;;  %v330_v18 = vand.u32 4294901760, %v329_v15  ;;  %v335_v19 = vsub.f32 %v333_v12, %v334_v16  ;;  %v342_v23 = vand.u32 4294901760, %v341_v22 }
  0x2b   : > { %v245_v63 = vsel %vm235_vm0, %v234_v62, 0.0  ;;  %366 = vmatpush.msra.mxu2 %v327_v7  ;;  %396 = vmatpush.msra.mxu3 %v295_v8 }
  0x2c   : > { %296 = vmatpush.msra.mxu0 %v295_v8  ;;  %v324_v14 = vand.u32 4294901760, %v323_v10  ;;  %v336_v21 = vand.u32 4294901760, %v335_v19 }
  0x2d   : > { %369 = vmatpush.msra.mxu2 %v333_v12  ;;  %398 = vmatpush.msra.mxu3 %v297_v13 }
  0x2e   : > { %298 = vmatpush.msra.mxu0 %v297_v13  ;;  %325 = vmatpush.msra.mxu1 %v324_v14 }
  0x2f   : > { %372 = vmatpush.msra.mxu2 %v339_v17 }
  0x30   : > { %240 = vadd.xlane.f32.xlu0 %v239_v61  ;;  %246 = vadd.xlane.f32.xlu1 %v245_v63 }
  0x31   : > { %421 = vmatpush.msrb.mxu0 %v322_v6  ;;  %331 = vmatpush.msra.mxu1 %v330_v18 }
  0x33   : > { %425 = vmatpush.msrb.mxu0 %v328_v11  ;;  %337 = vmatpush.msra.mxu1 %v336_v21 }
  0x35   : > { %429 = vmatpush.msrb.mxu0 %v334_v16  ;;  %343 = vmatpush.msra.mxu1 %v342_v23 }
  0x37   : > { %433 = vmatpush.msrb.mxu0 %v340_v20  ;;  %452 = vmatpush.msrb.mxu1 %v291_v1 }
  0x39   : > { %454 = vmatpush.msrb.mxu1 %v293_v4 }
  0x3b   : > { %456 = vmatpush.msrb.mxu1 %v295_v8 }
  0x3d   : > { %458 = vmatpush.msrb.mxu1 %v297_v13 }
  0x9b   : > { %v238_v25 = vpop.xlane.xlu0 %237  ;;  %v244_v26 = vpop.xlane.xlu1 %243 }
  0x9c   : > { %v248_v28 = vmul.f32 0.0625, %v238_v25  ;;  %v250_v31 = vmul.f32 0.0625, %v244_v26 }
  0x9e   : > { %v263_v35 = vperm.slane %v248_v28, %v262_v27  ;;  %v269_v38 = vperm.slane %v250_v31, %v268_v30 }
  0xa3   : > { %v241_v32 = vpop.xlane.xlu0 %240  ;;  %v247_v37 = vpop.xlane.xlu1 %246 }
  0xa4   : > { %v249_v33 = vmul.f32 0.0625, %v241_v32  ;;  %v251_v39 = vmul.f32 0.0625, %v247_v37 }
  0xa6   : > { %v265_v36 = vperm.slane %v249_v33, %v264_v29  ;;  %v273_v42 = vperm.slane %v251_v39, %v272_v34 }
  0xa8   : > { %v267_v40 = vsel %vm266_vm1, %v265_v36, %v263_v35 }
  0xa9   : > { %v271_v41 = vsel %vm270_vm2, %v269_v38, %v267_v40 }
  0xaa   : > { %v275_v43 = vsel %vm274_vm3, %v273_v42, %v271_v41 }
  0xab   : > { %v277_v44 = vsel %vm276_vm4, %v275_v43, 0 }
  0xac   : > { %v299_v45 = vand.u32 4294901760, %v277_v44 }
  0xae   : > { %345 = vmatmul.f32.vlgmr.msra.gmra.mxu1 %v299_v45  ;;  %v300_v46 = vsub.f32 %v277_v44, %v299_v45 }
  0xb0   : > { %375 = vmatmul.f32.vlgmr.msra.gmra.mxu2 %v300_v46  ;;  %v301_v47 = vand.u32 4294901760, %v300_v46 }
  0xb2   : > { %402 = vmatmul.f32.vlgmr.msra.gmra.mxu3 %v301_v47  ;;  %v302_v48 = vsub.f32 %v300_v46, %v301_v47 }
  0xb4   : > { %v303_v49 = vand.u32 4294901760, %v302_v48 }
  0xb6   : > { %304 = vmatmul.f32.vlgmr.msra.gmra.mxu0 %v303_v49  ;;  %460 = vmatmul.f32.vlgmr.msrb.gmra.mxu1 %v299_v45 }
  0xbe   : > { %435 = vmatmul.f32.vlgmr.msrb.gmra.mxu0 %v299_v45 }
 0x12b   : > { %v346_v51 = vpop.f32.mrf.mxu1 }
 0x133   : > { %v305_v52 = vpop.f32.mrf.mxu0  ;;  %v376_v55 = vpop.f32.mrf.mxu2 }
 0x134   : > { %v306_v53 = vadd.f32 %v305_v52, %v256_v50  ;;  %v461_v61 = vpop.f32.mrf.mxu1 }
 0x135   : > { %v403_v57 = vpop.f32.mrf.mxu3 }
 0x136   : > { %v347_v54 = vadd.f32 %v346_v51, %v306_v53 }
 0x138   : > { %v377_v56 = vadd.f32 %v376_v55, %v347_v54 }
 0x13a   : > { %v404_v58 = vadd.f32 %v403_v57, %v377_v56 }
 0x13b   : > { %v436_v59 = vpop.f32.mrf.mxu0 }
 0x13c   : > { %v437_v60 = vadd.f32 %v436_v59, %v404_v58 }
 0x13e   : > { %v462_v62 = vadd.f32 %v461_v61, %v437_v60 }
 0x140   : > { %464 = vst [vmem:[%s162_s25] sm:$0x1] %v462_v62 }
 0x141   : > { %636 = shalt.err (!%p633_p3)
}
 0x142   : > { %570 = dma.vmem_to_hbm [thread:$0]  (%p731_p5), %s477_s26, 16, %s479_s27, %s466_s28  }
 0x143 PF: > { %p576_p4 = scmp.ge.s32.totalorder %s671_s15, 2  ;;  %s490_s8 = sand.u32 1, %s659_s12  }
 0x144   : > { %s491_s9 = scalar_lea.sflag [#allocation3], %s490_s8 }
 0x145   : > { %p573_p7 = pnand %p576_p4, %p735_p6 }
 0x147   : > { %p574_p8 = pneg %p573_p7 }
 0x149   : > { %654 = dma.done.wait (%p574_p8), %s491_s9, 16  }
 0x14a   : > { %656 = vsyncadd (%p574_p8), %s491_s9, 4294967280  ;;  %p13_p9 = scmp.ge.s32.totalorder %s718_s18, 4   ;;  %s837_s12 = smov %s663_s13 }
 0x14b   : > { %s838_s13 = smov %s667_s14  ;;  %s839_s14 = smov %s729_s21 }
 0x14c   : > { %s840_s15 = smov %s718_s18  ;;  %15 = sbr.rel (!%p13_p9) target bundleno = 3 (0x3), region = 74 }
 0x151   :  { %496 = vsyncpa [#allocation3], 1 }
 0x152   :  { %498 = vsyncpa [#allocation3 + $0x1], 1 }

</bundles_post_ra>
